<compile_context>
chip_gen: v7x
topology: tpu7x:2x2x1
jax: 0.10.0
libtpu: 0.0.40
codegen_flags: <defaults>
</compile_context>

<pallas_src>
import jax
import jax.numpy as jnp
from jax.experimental import pallas as pl
from jax.experimental.pallas import tpu as pltpu

INPUT_SIZE = 3
HIDDEN_SIZE = 5          # hardcoded "5" in the PyTorch module
NUM_CLASSES = 10
LANE = 128               # TPU lane width (batch rows mapped onto lanes)


def mlp_kernel(x_ref, w1_ref, b1_ref, w2_ref, b2_ref, o_ref):
    # x_ref : (IN, Rt, 128) VMEM   -- feature-k slab = one dense (Rt,128) tile
    # w1_ref: (IN, H)  SMEM        b1_ref: (1, H)  SMEM
    # w2_ref: (H, OUT) SMEM        b2_ref: (1, OUT) SMEM
    # o_ref : (OUT, Rt, 128) VMEM  -- class-major output, dense slab stores
    in_f = x_ref.shape[0]
    hid, out_f = w2_ref.shape

    x = [x_ref[k] for k in range(in_f)]          # IN dense (Rt,128) tiles

    # ---- layer 1: h_j = relu(sum_k w1[k,j] * x_k + b1[j]) ------------------
    # scalar(SMEM)-operand VPU FMAs; bias added last to match reference order.
    h = []
    for j in range(hid):                         # H = 5, fully unrolled
        acc = x[0] * w1_ref[0, j]
        for k in range(1, in_f):                 # IN = 3
            acc = acc + x[k] * w1_ref[k, j]
        acc = acc + b1_ref[0, j]
        h.append(jnp.maximum(acc, 0.0))          # ReLU

    # ---- layer 2: y_c = sum_j w2[j,c] * h_j + b2[c] ------------------------
    for c in range(out_f):                       # OUT = 10, fully unrolled
        y = h[0] * w2_ref[0, c]
        for j in range(1, hid):
            y = y + h[j] * w2_ref[j, c]
        y = y + b2_ref[0, c]
        o_ref[c] = y.astype(o_ref.dtype)         # dense (Rt,128) store


def _choose_tiling(batch, block_batch):
    """Pick (rows_per_tile, padded_batch); both multiples of 128."""
    b128 = pl.cdiv(batch, LANE) * LANE
    if b128 <= block_batch:
        if b128 >= 2 * 1024:
            # big enough to split: give both v7x TensorCores a tile
            tb = pl.cdiv(b128 // 2, 1024) * 1024
        else:
            return b128, b128                    # single exactly-padded tile
    else:
        tb = max(1024, (block_batch // 1024) * 1024)
    b_pad = pl.cdiv(batch, tb) * tb
    return tb, b_pad


def mlp_forward(x, w1, b1, w2, b2, *, block_batch=4096, class_major=False):
    batch, in_f = x.shape
    out_f = w2.shape[1]

    tb, b_pad = _choose_tiling(batch, block_batch)
    rt = tb // LANE
    r_total = b_pad // LANE

    # Feature-major layout: (batch, IN) -> (IN, b_pad) -> (IN, R, 128).
    # Only x's tail is padded (12 B/row); weights need no padding at all.
    xt = x.T
    if b_pad != batch:
        xt = jnp.pad(xt, ((0, 0), (0, b_pad - batch)))
    xt = xt.reshape(in_f, r_total, LANE)

    out = pl.pallas_call(
        mlp_kernel,
        out_shape=jax.ShapeDtypeStruct((out_f, r_total, LANE), jnp.float32),
        grid=(r_total // rt,),
        in_specs=[
            pl.BlockSpec((in_f, rt, LANE), lambda i: (0, i, 0)),   # streamed x
            pl.BlockSpec(memory_space=pltpu.MemorySpace.SMEM),     # w1 (IN,H)
            pl.BlockSpec(memory_space=pltpu.MemorySpace.SMEM),     # b1 (1,H)
            pl.BlockSpec(memory_space=pltpu.MemorySpace.SMEM),     # w2 (H,OUT)
            pl.BlockSpec(memory_space=pltpu.MemorySpace.SMEM),     # b2 (1,OUT)
        ],
        out_specs=pl.BlockSpec((out_f, rt, LANE), lambda i: (0, i, 0)),
        compiler_params=pltpu.CompilerParams(
            dimension_semantics=("parallel",)),  # independent batch tiles
    )(xt, w1, b1, w2, b2)

    out = out.reshape(out_f, b_pad)
    if class_major:
        # (num_classes, padded_batch); columns >= batch are padding garbage.
        return out
    # Cheap narrowing: only 40 B/row of useful data is re-read here.
    return out[:, :batch].T


def init_params(key, input_size, hidden_size, output_size):
    """Deterministic init mimicking PyTorch Linear's U(-1/sqrt(fan_in), ...)."""
    k1, k2, k3, k4 = jax.random.split(key, 4)
    bound1 = 1.0 / jnp.sqrt(input_size)
    bound2 = 1.0 / jnp.sqrt(hidden_size)
    # Stored transposed: (in, out) so the math is x @ W.
    w1 = jax.random.uniform(k1, (input_size, hidden_size), jnp.float32, -bound1, bound1)
    b1 = jax.random.uniform(k2, (1, hidden_size), jnp.float32, -bound1, bound1)
    w2 = jax.random.uniform(k3, (hidden_size, output_size), jnp.float32, -bound2, bound2)
    b2 = jax.random.uniform(k4, (1, output_size), jnp.float32, -bound2, bound2)
    return w1, b1, w2, b2


def _reference(x, w1, b1, w2, b2):
    hp = jax.lax.Precision.HIGHEST  # exact f32 to match the VPU kernel math
    h = jnp.maximum(jnp.dot(x, w1, precision=hp) + b1, 0.0)
    return jnp.dot(h, w2, precision=hp) + b2


if __name__ == "__main__":
    key = jax.random.PRNGKey(0)
    kx, kp = jax.random.split(key)

    # Small deterministic example consistent with the module (features = 3).
    batch = 8
    x = jax.random.normal(kx, (batch, INPUT_SIZE), dtype=jnp.float32)
    w1, b1, w2, b2 = init_params(kp, INPUT_SIZE, HIDDEN_SIZE, NUM_CLASSES)

    out = jax.block_until_ready(mlp_forward(x, w1, b1, w2, b2))
    ref = _reference(x, w1, b1, w2, b2)
    assert out.shape == (batch, NUM_CLASSES)
    assert jnp.allclose(out, ref, atol=1e-5, rtol=1e-5)

    # Exercise the multi-tile grid path (pipelining + tail padding).
    big_batch = 5000
    xb = jax.random.normal(jax.random.fold_in(kx, 1), (big_batch, INPUT_SIZE),
                           dtype=jnp.float32)
    outb = jax.block_until_ready(mlp_forward(xb, w1, b1, w2, b2, block_batch=2048))
    refb = _reference(xb, w1, b1, w2, b2)
    assert outb.shape == (big_batch, NUM_CLASSES)
    assert jnp.allclose(outb, refb, atol=1e-5, rtol=1e-5)

    print("KERNEL_OK")
</pallas_src>

<mosaic_0001>
module attributes {stable_mosaic.version = 11 : i64} {
  func.func @mlp_kernel(%arg0: i32, %arg1: memref<3x1x128xf32, #tpu.memory_space<vmem>>, %arg2: memref<3x5xf32, #tpu.memory_space<smem>>, %arg3: memref<1x5xf32, #tpu.memory_space<smem>>, %arg4: memref<5x10xf32, #tpu.memory_space<smem>>, %arg5: memref<1x10xf32, #tpu.memory_space<smem>>, %arg6: memref<10x1x128xf32, #tpu.memory_space<vmem>>) attributes {dimension_semantics = [#tpu.dimension_semantics<parallel>], iteration_bounds = array<i64: 1>, scalar_prefetch = 0 : i64, scratch_operands = 0 : i64, tpu.core_type = #tpu.core_type<tc>, window_params = [{transform_indices = @transform_0, window_bounds = array<i64: 3, 1, 128>}, {transform_indices = @transform_1, window_bounds = array<i64: 3, 5>}, {transform_indices = @transform_2, window_bounds = array<i64: 1, 5>}, {transform_indices = @transform_3, window_bounds = array<i64: 5, 10>}, {transform_indices = @transform_4, window_bounds = array<i64: 1, 10>}, {transform_indices = @transform_5, window_bounds = array<i64: 10, 1, 128>}]} {
    %c0 = arith.constant 0 : index
    %c0_0 = arith.constant 0 : index
    %c0_1 = arith.constant 0 : index
    %0 = vector.load %arg1[%c0, %c0_0, %c0_1] : memref<3x1x128xf32, #tpu.memory_space<vmem>>, vector<1x1x128xf32>
    %1 = vector.shape_cast %0 : vector<1x1x128xf32> to vector<1x128xf32>
    %c1 = arith.constant 1 : index
    %c0_2 = arith.constant 0 : index
    %c0_3 = arith.constant 0 : index
    %2 = vector.load %arg1[%c1, %c0_2, %c0_3] : memref<3x1x128xf32, #tpu.memory_space<vmem>>, vector<1x1x128xf32>
    %3 = vector.shape_cast %2 : vector<1x1x128xf32> to vector<1x128xf32>
    %c2 = arith.constant 2 : index
    %c0_4 = arith.constant 0 : index
    %c0_5 = arith.constant 0 : index
    %4 = vector.load %arg1[%c2, %c0_4, %c0_5] : memref<3x1x128xf32, #tpu.memory_space<vmem>>, vector<1x1x128xf32>
    %5 = vector.shape_cast %4 : vector<1x1x128xf32> to vector<1x128xf32>
    %c0_6 = arith.constant 0 : index
    %c0_7 = arith.constant 0 : index
    %6 = memref.load %arg2[%c0_6, %c0_7] : memref<3x5xf32, #tpu.memory_space<smem>>
    %7 = vector.broadcast %6 : f32 to vector<1x128xf32>
    %8 = arith.mulf %1, %7 : vector<1x128xf32>
    %c1_8 = arith.constant 1 : index
    %c0_9 = arith.constant 0 : index
    %9 = memref.load %arg2[%c1_8, %c0_9] : memref<3x5xf32, #tpu.memory_space<smem>>
    %10 = vector.broadcast %9 : f32 to vector<1x128xf32>
    %11 = arith.mulf %3, %10 : vector<1x128xf32>
    %12 = arith.addf %8, %11 : vector<1x128xf32>
    %c2_10 = arith.constant 2 : index
    %c0_11 = arith.constant 0 : index
    %13 = memref.load %arg2[%c2_10, %c0_11] : memref<3x5xf32, #tpu.memory_space<smem>>
    %14 = vector.broadcast %13 : f32 to vector<1x128xf32>
    %15 = arith.mulf %5, %14 : vector<1x128xf32>
    %16 = arith.addf %12, %15 : vector<1x128xf32>
    %c0_12 = arith.constant 0 : index
    %c0_13 = arith.constant 0 : index
    %17 = memref.load %arg3[%c0_12, %c0_13] : memref<1x5xf32, #tpu.memory_space<smem>>
    %18 = vector.broadcast %17 : f32 to vector<1x128xf32>
    %19 = arith.addf %16, %18 : vector<1x128xf32>
    %cst = arith.constant 0.000000e+00 : f32
    %20 = vector.broadcast %cst : f32 to vector<1x128xf32>
    %21 = arith.maximumf %19, %20 : vector<1x128xf32>
    %c0_14 = arith.constant 0 : index
    %c1_15 = arith.constant 1 : index
    %22 = memref.load %arg2[%c0_14, %c1_15] : memref<3x5xf32, #tpu.memory_space<smem>>
    %23 = vector.broadcast %22 : f32 to vector<1x128xf32>
    %24 = arith.mulf %1, %23 : vector<1x128xf32>
    %c1_16 = arith.constant 1 : index
    %c1_17 = arith.constant 1 : index
    %25 = memref.load %arg2[%c1_16, %c1_17] : memref<3x5xf32, #tpu.memory_space<smem>>
    %26 = vector.broadcast %25 : f32 to vector<1x128xf32>
    %27 = arith.mulf %3, %26 : vector<1x128xf32>
    %28 = arith.addf %24, %27 : vector<1x128xf32>
    %c2_18 = arith.constant 2 : index
    %c1_19 = arith.constant 1 : index
    %29 = memref.load %arg2[%c2_18, %c1_19] : memref<3x5xf32, #tpu.memory_space<smem>>
    %30 = vector.broadcast %29 : f32 to vector<1x128xf32>
    %31 = arith.mulf %5, %30 : vector<1x128xf32>
    %32 = arith.addf %28, %31 : vector<1x128xf32>
    %c0_20 = arith.constant 0 : index
    %c1_21 = arith.constant 1 : index
    %33 = memref.load %arg3[%c0_20, %c1_21] : memref<1x5xf32, #tpu.memory_space<smem>>
    %34 = vector.broadcast %33 : f32 to vector<1x128xf32>
    %35 = arith.addf %32, %34 : vector<1x128xf32>
    %cst_22 = arith.constant 0.000000e+00 : f32
    %36 = vector.broadcast %cst_22 : f32 to vector<1x128xf32>
    %37 = arith.maximumf %35, %36 : vector<1x128xf32>
    %c0_23 = arith.constant 0 : index
    %c2_24 = arith.constant 2 : index
    %38 = memref.load %arg2[%c0_23, %c2_24] : memref<3x5xf32, #tpu.memory_space<smem>>
    %39 = vector.broadcast %38 : f32 to vector<1x128xf32>
    %40 = arith.mulf %1, %39 : vector<1x128xf32>
    %c1_25 = arith.constant 1 : index
    %c2_26 = arith.constant 2 : index
    %41 = memref.load %arg2[%c1_25, %c2_26] : memref<3x5xf32, #tpu.memory_space<smem>>
    %42 = vector.broadcast %41 : f32 to vector<1x128xf32>
    %43 = arith.mulf %3, %42 : vector<1x128xf32>
    %44 = arith.addf %40, %43 : vector<1x128xf32>
    %c2_27 = arith.constant 2 : index
    %c2_28 = arith.constant 2 : index
    %45 = memref.load %arg2[%c2_27, %c2_28] : memref<3x5xf32, #tpu.memory_space<smem>>
    %46 = vector.broadcast %45 : f32 to vector<1x128xf32>
    %47 = arith.mulf %5, %46 : vector<1x128xf32>
    %48 = arith.addf %44, %47 : vector<1x128xf32>
    %c0_29 = arith.constant 0 : index
    %c2_30 = arith.constant 2 : index
    %49 = memref.load %arg3[%c0_29, %c2_30] : memref<1x5xf32, #tpu.memory_space<smem>>
    %50 = vector.broadcast %49 : f32 to vector<1x128xf32>
    %51 = arith.addf %48, %50 : vector<1x128xf32>
    %cst_31 = arith.constant 0.000000e+00 : f32
    %52 = vector.broadcast %cst_31 : f32 to vector<1x128xf32>
    %53 = arith.maximumf %51, %52 : vector<1x128xf32>
    %c0_32 = arith.constant 0 : index
    %c3 = arith.constant 3 : index
    %54 = memref.load %arg2[%c0_32, %c3] : memref<3x5xf32, #tpu.memory_space<smem>>
    %55 = vector.broadcast %54 : f32 to vector<1x128xf32>
    %56 = arith.mulf %1, %55 : vector<1x128xf32>
    %c1_33 = arith.constant 1 : index
    %c3_34 = arith.constant 3 : index
    %57 = memref.load %arg2[%c1_33, %c3_34] : memref<3x5xf32, #tpu.memory_space<smem>>
    %58 = vector.broadcast %57 : f32 to vector<1x128xf32>
    %59 = arith.mulf %3, %58 : vector<1x128xf32>
    %60 = arith.addf %56, %59 : vector<1x128xf32>
    %c2_35 = arith.constant 2 : index
    %c3_36 = arith.constant 3 : index
    %61 = memref.load %arg2[%c2_35, %c3_36] : memref<3x5xf32, #tpu.memory_space<smem>>
    %62 = vector.broadcast %61 : f32 to vector<1x128xf32>
    %63 = arith.mulf %5, %62 : vector<1x128xf32>
    %64 = arith.addf %60, %63 : vector<1x128xf32>
    %c0_37 = arith.constant 0 : index
    %c3_38 = arith.constant 3 : index
    %65 = memref.load %arg3[%c0_37, %c3_38] : memref<1x5xf32, #tpu.memory_space<smem>>
    %66 = vector.broadcast %65 : f32 to vector<1x128xf32>
    %67 = arith.addf %64, %66 : vector<1x128xf32>
    %cst_39 = arith.constant 0.000000e+00 : f32
    %68 = vector.broadcast %cst_39 : f32 to vector<1x128xf32>
    %69 = arith.maximumf %67, %68 : vector<1x128xf32>
    %c0_40 = arith.constant 0 : index
    %c4 = arith.constant 4 : index
    %70 = memref.load %arg2[%c0_40, %c4] : memref<3x5xf32, #tpu.memory_space<smem>>
    %71 = vector.broadcast %70 : f32 to vector<1x128xf32>
    %72 = arith.mulf %1, %71 : vector<1x128xf32>
    %c1_41 = arith.constant 1 : index
    %c4_42 = arith.constant 4 : index
    %73 = memref.load %arg2[%c1_41, %c4_42] : memref<3x5xf32, #tpu.memory_space<smem>>
    %74 = vector.broadcast %73 : f32 to vector<1x128xf32>
    %75 = arith.mulf %3, %74 : vector<1x128xf32>
    %76 = arith.addf %72, %75 : vector<1x128xf32>
    %c2_43 = arith.constant 2 : index
    %c4_44 = arith.constant 4 : index
    %77 = memref.load %arg2[%c2_43, %c4_44] : memref<3x5xf32, #tpu.memory_space<smem>>
    %78 = vector.broadcast %77 : f32 to vector<1x128xf32>
    %79 = arith.mulf %5, %78 : vector<1x128xf32>
    %80 = arith.addf %76, %79 : vector<1x128xf32>
    %c0_45 = arith.constant 0 : index
    %c4_46 = arith.constant 4 : index
    %81 = memref.load %arg3[%c0_45, %c4_46] : memref<1x5xf32, #tpu.memory_space<smem>>
    %82 = vector.broadcast %81 : f32 to vector<1x128xf32>
    %83 = arith.addf %80, %82 : vector<1x128xf32>
    %cst_47 = arith.constant 0.000000e+00 : f32
    %84 = vector.broadcast %cst_47 : f32 to vector<1x128xf32>
    %85 = arith.maximumf %83, %84 : vector<1x128xf32>
    %c0_48 = arith.constant 0 : index
    %c0_49 = arith.constant 0 : index
    %86 = memref.load %arg4[%c0_48, %c0_49] : memref<5x10xf32, #tpu.memory_space<smem>>
    %87 = vector.broadcast %86 : f32 to vector<1x128xf32>
    %88 = arith.mulf %21, %87 : vector<1x128xf32>
    %c1_50 = arith.constant 1 : index
    %c0_51 = arith.constant 0 : index
    %89 = memref.load %arg4[%c1_50, %c0_51] : memref<5x10xf32, #tpu.memory_space<smem>>
    %90 = vector.broadcast %89 : f32 to vector<1x128xf32>
    %91 = arith.mulf %37, %90 : vector<1x128xf32>
    %92 = arith.addf %88, %91 : vector<1x128xf32>
    %c2_52 = arith.constant 2 : index
    %c0_53 = arith.constant 0 : index
    %93 = memref.load %arg4[%c2_52, %c0_53] : memref<5x10xf32, #tpu.memory_space<smem>>
    %94 = vector.broadcast %93 : f32 to vector<1x128xf32>
    %95 = arith.mulf %53, %94 : vector<1x128xf32>
    %96 = arith.addf %92, %95 : vector<1x128xf32>
    %c3_54 = arith.constant 3 : index
    %c0_55 = arith.constant 0 : index
    %97 = memref.load %arg4[%c3_54, %c0_55] : memref<5x10xf32, #tpu.memory_space<smem>>
    %98 = vector.broadcast %97 : f32 to vector<1x128xf32>
    %99 = arith.mulf %69, %98 : vector<1x128xf32>
    %100 = arith.addf %96, %99 : vector<1x128xf32>
    %c4_56 = arith.constant 4 : index
    %c0_57 = arith.constant 0 : index
    %101 = memref.load %arg4[%c4_56, %c0_57] : memref<5x10xf32, #tpu.memory_space<smem>>
    %102 = vector.broadcast %101 : f32 to vector<1x128xf32>
    %103 = arith.mulf %85, %102 : vector<1x128xf32>
    %104 = arith.addf %100, %103 : vector<1x128xf32>
    %c0_58 = arith.constant 0 : index
    %c0_59 = arith.constant 0 : index
    %105 = memref.load %arg5[%c0_58, %c0_59] : memref<1x10xf32, #tpu.memory_space<smem>>
    %106 = vector.broadcast %105 : f32 to vector<1x128xf32>
    %107 = arith.addf %104, %106 : vector<1x128xf32>
    %c0_60 = arith.constant 0 : index
    %c0_61 = arith.constant 0 : index
    %c0_62 = arith.constant 0 : index
    %108 = vector.load %arg6[%c0_60, %c0_61, %c0_62] : memref<10x1x128xf32, #tpu.memory_space<vmem>>, vector<1x1x128xf32>
    %109 = vector.shape_cast %108 : vector<1x1x128xf32> to vector<1x128xf32>
    %110 = vector.shape_cast %107 : vector<1x128xf32> to vector<1x1x128xf32>
    tpu.vector_store %arg6[%c0_60, %c0_61, %c0_62], %110 {strides = array<i32>} : memref<10x1x128xf32, #tpu.memory_space<vmem>>, vector<1x1x128xf32>,
    %c0_63 = arith.constant 0 : index
    %c1_64 = arith.constant 1 : index
    %111 = memref.load %arg4[%c0_63, %c1_64] : memref<5x10xf32, #tpu.memory_space<smem>>
    %112 = vector.broadcast %111 : f32 to vector<1x128xf32>
    %113 = arith.mulf %21, %112 : vector<1x128xf32>
    %c1_65 = arith.constant 1 : index
    %c1_66 = arith.constant 1 : index
    %114 = memref.load %arg4[%c1_65, %c1_66] : memref<5x10xf32, #tpu.memory_space<smem>>
    %115 = vector.broadcast %114 : f32 to vector<1x128xf32>
    %116 = arith.mulf %37, %115 : vector<1x128xf32>
    %117 = arith.addf %113, %116 : vector<1x128xf32>
    %c2_67 = arith.constant 2 : index
    %c1_68 = arith.constant 1 : index
    %118 = memref.load %arg4[%c2_67, %c1_68] : memref<5x10xf32, #tpu.memory_space<smem>>
    %119 = vector.broadcast %118 : f32 to vector<1x128xf32>
    %120 = arith.mulf %53, %119 : vector<1x128xf32>
    %121 = arith.addf %117, %120 : vector<1x128xf32>
    %c3_69 = arith.constant 3 : index
    %c1_70 = arith.constant 1 : index
    %122 = memref.load %arg4[%c3_69, %c1_70] : memref<5x10xf32, #tpu.memory_space<smem>>
    %123 = vector.broadcast %122 : f32 to vector<1x128xf32>
    %124 = arith.mulf %69, %123 : vector<1x128xf32>
    %125 = arith.addf %121, %124 : vector<1x128xf32>
    %c4_71 = arith.constant 4 : index
    %c1_72 = arith.constant 1 : index
    %126 = memref.load %arg4[%c4_71, %c1_72] : memref<5x10xf32, #tpu.memory_space<smem>>
    %127 = vector.broadcast %126 : f32 to vector<1x128xf32>
    %128 = arith.mulf %85, %127 : vector<1x128xf32>
    %129 = arith.addf %125, %128 : vector<1x128xf32>
    %c0_73 = arith.constant 0 : index
    %c1_74 = arith.constant 1 : index
    %130 = memref.load %arg5[%c0_73, %c1_74] : memref<1x10xf32, #tpu.memory_space<smem>>
    %131 = vector.broadcast %130 : f32 to vector<1x128xf32>
    %132 = arith.addf %129, %131 : vector<1x128xf32>
    %c1_75 = arith.constant 1 : index
    %c0_76 = arith.constant 0 : index
    %c0_77 = arith.constant 0 : index
    %133 = vector.load %arg6[%c1_75, %c0_76, %c0_77] : memref<10x1x128xf32, #tpu.memory_space<vmem>>, vector<1x1x128xf32>
    %134 = vector.shape_cast %133 : vector<1x1x128xf32> to vector<1x128xf32>
    %135 = vector.shape_cast %132 : vector<1x128xf32> to vector<1x1x128xf32>
    tpu.vector_store %arg6[%c1_75, %c0_76, %c0_77], %135 {strides = array<i32>} : memref<10x1x128xf32, #tpu.memory_space<vmem>>, vector<1x1x128xf32>,
    %c0_78 = arith.constant 0 : index
    %c2_79 = arith.constant 2 : index
    %136 = memref.load %arg4[%c0_78, %c2_79] : memref<5x10xf32, #tpu.memory_space<smem>>
    %137 = vector.broadcast %136 : f32 to vector<1x128xf32>
    %138 = arith.mulf %21, %137 : vector<1x128xf32>
    %c1_80 = arith.constant 1 : index
    %c2_81 = arith.constant 2 : index
    %139 = memref.load %arg4[%c1_80, %c2_81] : memref<5x10xf32, #tpu.memory_space<smem>>
    %140 = vector.broadcast %139 : f32 to vector<1x128xf32>
    %141 = arith.mulf %37, %140 : vector<1x128xf32>
    %142 = arith.addf %138, %141 : vector<1x128xf32>
    %c2_82 = arith.constant 2 : index
    %c2_83 = arith.constant 2 : index
    %143 = memref.load %arg4[%c2_82, %c2_83] : memref<5x10xf32, #tpu.memory_space<smem>>
    %144 = vector.broadcast %143 : f32 to vector<1x128xf32>
    %145 = arith.mulf %53, %144 : vector<1x128xf32>
    %146 = arith.addf %142, %145 : vector<1x128xf32>
    %c3_84 = arith.constant 3 : index
    %c2_85 = arith.constant 2 : index
    %147 = memref.load %arg4[%c3_84, %c2_85] : memref<5x10xf32, #tpu.memory_space<smem>>
    %148 = vector.broadcast %147 : f32 to vector<1x128xf32>
    %149 = arith.mulf %69, %148 : vector<1x128xf32>
    %150 = arith.addf %146, %149 : vector<1x128xf32>
    %c4_86 = arith.constant 4 : index
    %c2_87 = arith.constant 2 : index
    %151 = memref.load %arg4[%c4_86, %c2_87] : memref<5x10xf32, #tpu.memory_space<smem>>
    %152 = vector.broadcast %151 : f32 to vector<1x128xf32>
    %153 = arith.mulf %85, %152 : vector<1x128xf32>
    %154 = arith.addf %150, %153 : vector<1x128xf32>
    %c0_88 = arith.constant 0 : index
    %c2_89 = arith.constant 2 : index
    %155 = memref.load %arg5[%c0_88, %c2_89] : memref<1x10xf32, #tpu.memory_space<smem>>
    %156 = vector.broadcast %155 : f32 to vector<1x128xf32>
    %157 = arith.addf %154, %156 : vector<1x128xf32>
    %c2_90 = arith.constant 2 : index
    %c0_91 = arith.constant 0 : index
    %c0_92 = arith.constant 0 : index
    %158 = vector.load %arg6[%c2_90, %c0_91, %c0_92] : memref<10x1x128xf32, #tpu.memory_space<vmem>>, vector<1x1x128xf32>
    %159 = vector.shape_cast %158 : vector<1x1x128xf32> to vector<1x128xf32>
    %160 = vector.shape_cast %157 : vector<1x128xf32> to vector<1x1x128xf32>
    tpu.vector_store %arg6[%c2_90, %c0_91, %c0_92], %160 {strides = array<i32>} : memref<10x1x128xf32, #tpu.memory_space<vmem>>, vector<1x1x128xf32>,
    %c0_93 = arith.constant 0 : index
    %c3_94 = arith.constant 3 : index
    %161 = memref.load %arg4[%c0_93, %c3_94] : memref<5x10xf32, #tpu.memory_space<smem>>
    %162 = vector.broadcast %161 : f32 to vector<1x128xf32>
    %163 = arith.mulf %21, %162 : vector<1x128xf32>
    %c1_95 = arith.constant 1 : index
    %c3_96 = arith.constant 3 : index
    %164 = memref.load %arg4[%c1_95, %c3_96] : memref<5x10xf32, #tpu.memory_space<smem>>
    %165 = vector.broadcast %164 : f32 to vector<1x128xf32>
    %166 = arith.mulf %37, %165 : vector<1x128xf32>
    %167 = arith.addf %163, %166 : vector<1x128xf32>
    %c2_97 = arith.constant 2 : index
    %c3_98 = arith.constant 3 : index
    %168 = memref.load %arg4[%c2_97, %c3_98] : memref<5x10xf32, #tpu.memory_space<smem>>
    %169 = vector.broadcast %168 : f32 to vector<1x128xf32>
    %170 = arith.mulf %53, %169 : vector<1x128xf32>
    %171 = arith.addf %167, %170 : vector<1x128xf32>
    %c3_99 = arith.constant 3 : index
    %c3_100 = arith.constant 3 : index
    %172 = memref.load %arg4[%c3_99, %c3_100] : memref<5x10xf32, #tpu.memory_space<smem>>
    %173 = vector.broadcast %172 : f32 to vector<1x128xf32>
    %174 = arith.mulf %69, %173 : vector<1x128xf32>
    %175 = arith.addf %171, %174 : vector<1x128xf32>
    %c4_101 = arith.constant 4 : index
    %c3_102 = arith.constant 3 : index
    %176 = memref.load %arg4[%c4_101, %c3_102] : memref<5x10xf32, #tpu.memory_space<smem>>
    %177 = vector.broadcast %176 : f32 to vector<1x128xf32>
    %178 = arith.mulf %85, %177 : vector<1x128xf32>
    %179 = arith.addf %175, %178 : vector<1x128xf32>
    %c0_103 = arith.constant 0 : index
    %c3_104 = arith.constant 3 : index
    %180 = memref.load %arg5[%c0_103, %c3_104] : memref<1x10xf32, #tpu.memory_space<smem>>
    %181 = vector.broadcast %180 : f32 to vector<1x128xf32>
    %182 = arith.addf %179, %181 : vector<1x128xf32>
    %c3_105 = arith.constant 3 : index
    %c0_106 = arith.constant 0 : index
    %c0_107 = arith.constant 0 : index
    %183 = vector.load %arg6[%c3_105, %c0_106, %c0_107] : memref<10x1x128xf32, #tpu.memory_space<vmem>>, vector<1x1x128xf32>
    %184 = vector.shape_cast %183 : vector<1x1x128xf32> to vector<1x128xf32>
    %185 = vector.shape_cast %182 : vector<1x128xf32> to vector<1x1x128xf32>
    tpu.vector_store %arg6[%c3_105, %c0_106, %c0_107], %185 {strides = array<i32>} : memref<10x1x128xf32, #tpu.memory_space<vmem>>, vector<1x1x128xf32>,
    %c0_108 = arith.constant 0 : index
    %c4_109 = arith.constant 4 : index
    %186 = memref.load %arg4[%c0_108, %c4_109] : memref<5x10xf32, #tpu.memory_space<smem>>
    %187 = vector.broadcast %186 : f32 to vector<1x128xf32>
    %188 = arith.mulf %21, %187 : vector<1x128xf32>
    %c1_110 = arith.constant 1 : index
    %c4_111 = arith.constant 4 : index
    %189 = memref.load %arg4[%c1_110, %c4_111] : memref<5x10xf32, #tpu.memory_space<smem>>
    %190 = vector.broadcast %189 : f32 to vector<1x128xf32>
    %191 = arith.mulf %37, %190 : vector<1x128xf32>
    %192 = arith.addf %188, %191 : vector<1x128xf32>
    %c2_112 = arith.constant 2 : index
    %c4_113 = arith.constant 4 : index
    %193 = memref.load %arg4[%c2_112, %c4_113] : memref<5x10xf32, #tpu.memory_space<smem>>
    %194 = vector.broadcast %193 : f32 to vector<1x128xf32>
    %195 = arith.mulf %53, %194 : vector<1x128xf32>
    %196 = arith.addf %192, %195 : vector<1x128xf32>
    %c3_114 = arith.constant 3 : index
    %c4_115 = arith.constant 4 : index
    %197 = memref.load %arg4[%c3_114, %c4_115] : memref<5x10xf32, #tpu.memory_space<smem>>
    %198 = vector.broadcast %197 : f32 to vector<1x128xf32>
    %199 = arith.mulf %69, %198 : vector<1x128xf32>
    %200 = arith.addf %196, %199 : vector<1x128xf32>
    %c4_116 = arith.constant 4 : index
    %c4_117 = arith.constant 4 : index
    %201 = memref.load %arg4[%c4_116, %c4_117] : memref<5x10xf32, #tpu.memory_space<smem>>
    %202 = vector.broadcast %201 : f32 to vector<1x128xf32>
    %203 = arith.mulf %85, %202 : vector<1x128xf32>
    %204 = arith.addf %200, %203 : vector<1x128xf32>
    %c0_118 = arith.constant 0 : index
    %c4_119 = arith.constant 4 : index
    %205 = memref.load %arg5[%c0_118, %c4_119] : memref<1x10xf32, #tpu.memory_space<smem>>
    %206 = vector.broadcast %205 : f32 to vector<1x128xf32>
    %207 = arith.addf %204, %206 : vector<1x128xf32>
    %c4_120 = arith.constant 4 : index
    %c0_121 = arith.constant 0 : index
    %c0_122 = arith.constant 0 : index
    %208 = vector.load %arg6[%c4_120, %c0_121, %c0_122] : memref<10x1x128xf32, #tpu.memory_space<vmem>>, vector<1x1x128xf32>
    %209 = vector.shape_cast %208 : vector<1x1x128xf32> to vector<1x128xf32>
    %210 = vector.shape_cast %207 : vector<1x128xf32> to vector<1x1x128xf32>
    tpu.vector_store %arg6[%c4_120, %c0_121, %c0_122], %210 {strides = array<i32>} : memref<10x1x128xf32, #tpu.memory_space<vmem>>, vector<1x1x128xf32>,
    %c0_123 = arith.constant 0 : index
    %c5 = arith.constant 5 : index
    %211 = memref.load %arg4[%c0_123, %c5] : memref<5x10xf32, #tpu.memory_space<smem>>
    %212 = vector.broadcast %211 : f32 to vector<1x128xf32>
    %213 = arith.mulf %21, %212 : vector<1x128xf32>
    %c1_124 = arith.constant 1 : index
    %c5_125 = arith.constant 5 : index
    %214 = memref.load %arg4[%c1_124, %c5_125] : memref<5x10xf32, #tpu.memory_space<smem>>
    %215 = vector.broadcast %214 : f32 to vector<1x128xf32>
    %216 = arith.mulf %37, %215 : vector<1x128xf32>
    %217 = arith.addf %213, %216 : vector<1x128xf32>
    %c2_126 = arith.constant 2 : index
    %c5_127 = arith.constant 5 : index
    %218 = memref.load %arg4[%c2_126, %c5_127] : memref<5x10xf32, #tpu.memory_space<smem>>
    %219 = vector.broadcast %218 : f32 to vector<1x128xf32>
    %220 = arith.mulf %53, %219 : vector<1x128xf32>
    %221 = arith.addf %217, %220 : vector<1x128xf32>
    %c3_128 = arith.constant 3 : index
    %c5_129 = arith.constant 5 : index
    %222 = memref.load %arg4[%c3_128, %c5_129] : memref<5x10xf32, #tpu.memory_space<smem>>
    %223 = vector.broadcast %222 : f32 to vector<1x128xf32>
    %224 = arith.mulf %69, %223 : vector<1x128xf32>
    %225 = arith.addf %221, %224 : vector<1x128xf32>
    %c4_130 = arith.constant 4 : index
    %c5_131 = arith.constant 5 : index
    %226 = memref.load %arg4[%c4_130, %c5_131] : memref<5x10xf32, #tpu.memory_space<smem>>
    %227 = vector.broadcast %226 : f32 to vector<1x128xf32>
    %228 = arith.mulf %85, %227 : vector<1x128xf32>
    %229 = arith.addf %225, %228 : vector<1x128xf32>
    %c0_132 = arith.constant 0 : index
    %c5_133 = arith.constant 5 : index
    %230 = memref.load %arg5[%c0_132, %c5_133] : memref<1x10xf32, #tpu.memory_space<smem>>
    %231 = vector.broadcast %230 : f32 to vector<1x128xf32>
    %232 = arith.addf %229, %231 : vector<1x128xf32>
    %c5_134 = arith.constant 5 : index
    %c0_135 = arith.constant 0 : index
    %c0_136 = arith.constant 0 : index
    %233 = vector.load %arg6[%c5_134, %c0_135, %c0_136] : memref<10x1x128xf32, #tpu.memory_space<vmem>>, vector<1x1x128xf32>
    %234 = vector.shape_cast %233 : vector<1x1x128xf32> to vector<1x128xf32>
    %235 = vector.shape_cast %232 : vector<1x128xf32> to vector<1x1x128xf32>
    tpu.vector_store %arg6[%c5_134, %c0_135, %c0_136], %235 {strides = array<i32>} : memref<10x1x128xf32, #tpu.memory_space<vmem>>, vector<1x1x128xf32>,
    %c0_137 = arith.constant 0 : index
    %c6 = arith.constant 6 : index
    %236 = memref.load %arg4[%c0_137, %c6] : memref<5x10xf32, #tpu.memory_space<smem>>
    %237 = vector.broadcast %236 : f32 to vector<1x128xf32>
    %238 = arith.mulf %21, %237 : vector<1x128xf32>
    %c1_138 = arith.constant 1 : index
    %c6_139 = arith.constant 6 : index
    %239 = memref.load %arg4[%c1_138, %c6_139] : memref<5x10xf32, #tpu.memory_space<smem>>
    %240 = vector.broadcast %239 : f32 to vector<1x128xf32>
    %241 = arith.mulf %37, %240 : vector<1x128xf32>
    %242 = arith.addf %238, %241 : vector<1x128xf32>
    %c2_140 = arith.constant 2 : index
    %c6_141 = arith.constant 6 : index
    %243 = memref.load %arg4[%c2_140, %c6_141] : memref<5x10xf32, #tpu.memory_space<smem>>
    %244 = vector.broadcast %243 : f32 to vector<1x128xf32>
    %245 = arith.mulf %53, %244 : vector<1x128xf32>
    %246 = arith.addf %242, %245 : vector<1x128xf32>
    %c3_142 = arith.constant 3 : index
    %c6_143 = arith.constant 6 : index
    %247 = memref.load %arg4[%c3_142, %c6_143] : memref<5x10xf32, #tpu.memory_space<smem>>
    %248 = vector.broadcast %247 : f32 to vector<1x128xf32>
    %249 = arith.mulf %69, %248 : vector<1x128xf32>
    %250 = arith.addf %246, %249 : vector<1x128xf32>
    %c4_144 = arith.constant 4 : index
    %c6_145 = arith.constant 6 : index
    %251 = memref.load %arg4[%c4_144, %c6_145] : memref<5x10xf32, #tpu.memory_space<smem>>
    %252 = vector.broadcast %251 : f32 to vector<1x128xf32>
    %253 = arith.mulf %85, %252 : vector<1x128xf32>
    %254 = arith.addf %250, %253 : vector<1x128xf32>
    %c0_146 = arith.constant 0 : index
    %c6_147 = arith.constant 6 : index
    %255 = memref.load %arg5[%c0_146, %c6_147] : memref<1x10xf32, #tpu.memory_space<smem>>
    %256 = vector.broadcast %255 : f32 to vector<1x128xf32>
    %257 = arith.addf %254, %256 : vector<1x128xf32>
    %c6_148 = arith.constant 6 : index
    %c0_149 = arith.constant 0 : index
    %c0_150 = arith.constant 0 : index
    %258 = vector.load %arg6[%c6_148, %c0_149, %c0_150] : memref<10x1x128xf32, #tpu.memory_space<vmem>>, vector<1x1x128xf32>
    %259 = vector.shape_cast %258 : vector<1x1x128xf32> to vector<1x128xf32>
    %260 = vector.shape_cast %257 : vector<1x128xf32> to vector<1x1x128xf32>
    tpu.vector_store %arg6[%c6_148, %c0_149, %c0_150], %260 {strides = array<i32>} : memref<10x1x128xf32, #tpu.memory_space<vmem>>, vector<1x1x128xf32>,
    %c0_151 = arith.constant 0 : index
    %c7 = arith.constant 7 : index
    %261 = memref.load %arg4[%c0_151, %c7] : memref<5x10xf32, #tpu.memory_space<smem>>
    %262 = vector.broadcast %261 : f32 to vector<1x128xf32>
    %263 = arith.mulf %21, %262 : vector<1x128xf32>
    %c1_152 = arith.constant 1 : index
    %c7_153 = arith.constant 7 : index
    %264 = memref.load %arg4[%c1_152, %c7_153] : memref<5x10xf32, #tpu.memory_space<smem>>
    %265 = vector.broadcast %264 : f32 to vector<1x128xf32>
    %266 = arith.mulf %37, %265 : vector<1x128xf32>
    %267 = arith.addf %263, %266 : vector<1x128xf32>
    %c2_154 = arith.constant 2 : index
    %c7_155 = arith.constant 7 : index
    %268 = memref.load %arg4[%c2_154, %c7_155] : memref<5x10xf32, #tpu.memory_space<smem>>
    %269 = vector.broadcast %268 : f32 to vector<1x128xf32>
    %270 = arith.mulf %53, %269 : vector<1x128xf32>
    %271 = arith.addf %267, %270 : vector<1x128xf32>
    %c3_156 = arith.constant 3 : index
    %c7_157 = arith.constant 7 : index
    %272 = memref.load %arg4[%c3_156, %c7_157] : memref<5x10xf32, #tpu.memory_space<smem>>
    %273 = vector.broadcast %272 : f32 to vector<1x128xf32>
    %274 = arith.mulf %69, %273 : vector<1x128xf32>
    %275 = arith.addf %271, %274 : vector<1x128xf32>
    %c4_158 = arith.constant 4 : index
    %c7_159 = arith.constant 7 : index
    %276 = memref.load %arg4[%c4_158, %c7_159] : memref<5x10xf32, #tpu.memory_space<smem>>
    %277 = vector.broadcast %276 : f32 to vector<1x128xf32>
    %278 = arith.mulf %85, %277 : vector<1x128xf32>
    %279 = arith.addf %275, %278 : vector<1x128xf32>
    %c0_160 = arith.constant 0 : index
    %c7_161 = arith.constant 7 : index
    %280 = memref.load %arg5[%c0_160, %c7_161] : memref<1x10xf32, #tpu.memory_space<smem>>
    %281 = vector.broadcast %280 : f32 to vector<1x128xf32>
    %282 = arith.addf %279, %281 : vector<1x128xf32>
    %c7_162 = arith.constant 7 : index
    %c0_163 = arith.constant 0 : index
    %c0_164 = arith.constant 0 : index
    %283 = vector.load %arg6[%c7_162, %c0_163, %c0_164] : memref<10x1x128xf32, #tpu.memory_space<vmem>>, vector<1x1x128xf32>
    %284 = vector.shape_cast %283 : vector<1x1x128xf32> to vector<1x128xf32>
    %285 = vector.shape_cast %282 : vector<1x128xf32> to vector<1x1x128xf32>
    tpu.vector_store %arg6[%c7_162, %c0_163, %c0_164], %285 {strides = array<i32>} : memref<10x1x128xf32, #tpu.memory_space<vmem>>, vector<1x1x128xf32>,
    %c0_165 = arith.constant 0 : index
    %c8 = arith.constant 8 : index
    %286 = memref.load %arg4[%c0_165, %c8] : memref<5x10xf32, #tpu.memory_space<smem>>
    %287 = vector.broadcast %286 : f32 to vector<1x128xf32>
    %288 = arith.mulf %21, %287 : vector<1x128xf32>
    %c1_166 = arith.constant 1 : index
    %c8_167 = arith.constant 8 : index
    %289 = memref.load %arg4[%c1_166, %c8_167] : memref<5x10xf32, #tpu.memory_space<smem>>
    %290 = vector.broadcast %289 : f32 to vector<1x128xf32>
    %291 = arith.mulf %37, %290 : vector<1x128xf32>
    %292 = arith.addf %288, %291 : vector<1x128xf32>
    %c2_168 = arith.constant 2 : index
    %c8_169 = arith.constant 8 : index
    %293 = memref.load %arg4[%c2_168, %c8_169] : memref<5x10xf32, #tpu.memory_space<smem>>
    %294 = vector.broadcast %293 : f32 to vector<1x128xf32>
    %295 = arith.mulf %53, %294 : vector<1x128xf32>
    %296 = arith.addf %292, %295 : vector<1x128xf32>
    %c3_170 = arith.constant 3 : index
    %c8_171 = arith.constant 8 : index
    %297 = memref.load %arg4[%c3_170, %c8_171] : memref<5x10xf32, #tpu.memory_space<smem>>
    %298 = vector.broadcast %297 : f32 to vector<1x128xf32>
    %299 = arith.mulf %69, %298 : vector<1x128xf32>
    %300 = arith.addf %296, %299 : vector<1x128xf32>
    %c4_172 = arith.constant 4 : index
    %c8_173 = arith.constant 8 : index
    %301 = memref.load %arg4[%c4_172, %c8_173] : memref<5x10xf32, #tpu.memory_space<smem>>
    %302 = vector.broadcast %301 : f32 to vector<1x128xf32>
    %303 = arith.mulf %85, %302 : vector<1x128xf32>
    %304 = arith.addf %300, %303 : vector<1x128xf32>
    %c0_174 = arith.constant 0 : index
    %c8_175 = arith.constant 8 : index
    %305 = memref.load %arg5[%c0_174, %c8_175] : memref<1x10xf32, #tpu.memory_space<smem>>
    %306 = vector.broadcast %305 : f32 to vector<1x128xf32>
    %307 = arith.addf %304, %306 : vector<1x128xf32>
    %c8_176 = arith.constant 8 : index
    %c0_177 = arith.constant 0 : index
    %c0_178 = arith.constant 0 : index
    %308 = vector.load %arg6[%c8_176, %c0_177, %c0_178] : memref<10x1x128xf32, #tpu.memory_space<vmem>>, vector<1x1x128xf32>
    %309 = vector.shape_cast %308 : vector<1x1x128xf32> to vector<1x128xf32>
    %310 = vector.shape_cast %307 : vector<1x128xf32> to vector<1x1x128xf32>
    tpu.vector_store %arg6[%c8_176, %c0_177, %c0_178], %310 {strides = array<i32>} : memref<10x1x128xf32, #tpu.memory_space<vmem>>, vector<1x1x128xf32>,
    %c0_179 = arith.constant 0 : index
    %c9 = arith.constant 9 : index
    %311 = memref.load %arg4[%c0_179, %c9] : memref<5x10xf32, #tpu.memory_space<smem>>
    %312 = vector.broadcast %311 : f32 to vector<1x128xf32>
    %313 = arith.mulf %21, %312 : vector<1x128xf32>
    %c1_180 = arith.constant 1 : index
    %c9_181 = arith.constant 9 : index
    %314 = memref.load %arg4[%c1_180, %c9_181] : memref<5x10xf32, #tpu.memory_space<smem>>
    %315 = vector.broadcast %314 : f32 to vector<1x128xf32>
    %316 = arith.mulf %37, %315 : vector<1x128xf32>
    %317 = arith.addf %313, %316 : vector<1x128xf32>
    %c2_182 = arith.constant 2 : index
    %c9_183 = arith.constant 9 : index
    %318 = memref.load %arg4[%c2_182, %c9_183] : memref<5x10xf32, #tpu.memory_space<smem>>
    %319 = vector.broadcast %318 : f32 to vector<1x128xf32>
    %320 = arith.mulf %53, %319 : vector<1x128xf32>
    %321 = arith.addf %317, %320 : vector<1x128xf32>
    %c3_184 = arith.constant 3 : index
    %c9_185 = arith.constant 9 : index
    %322 = memref.load %arg4[%c3_184, %c9_185] : memref<5x10xf32, #tpu.memory_space<smem>>
    %323 = vector.broadcast %322 : f32 to vector<1x128xf32>
    %324 = arith.mulf %69, %323 : vector<1x128xf32>
    %325 = arith.addf %321, %324 : vector<1x128xf32>
    %c4_186 = arith.constant 4 : index
    %c9_187 = arith.constant 9 : index
    %326 = memref.load %arg4[%c4_186, %c9_187] : memref<5x10xf32, #tpu.memory_space<smem>>
    %327 = vector.broadcast %326 : f32 to vector<1x128xf32>
    %328 = arith.mulf %85, %327 : vector<1x128xf32>
    %329 = arith.addf %325, %328 : vector<1x128xf32>
    %c0_188 = arith.constant 0 : index
    %c9_189 = arith.constant 9 : index
    %330 = memref.load %arg5[%c0_188, %c9_189] : memref<1x10xf32, #tpu.memory_space<smem>>
    %331 = vector.broadcast %330 : f32 to vector<1x128xf32>
    %332 = arith.addf %329, %331 : vector<1x128xf32>
    %c9_190 = arith.constant 9 : index
    %c0_191 = arith.constant 0 : index
    %c0_192 = arith.constant 0 : index
    %333 = vector.load %arg6[%c9_190, %c0_191, %c0_192] : memref<10x1x128xf32, #tpu.memory_space<vmem>>, vector<1x1x128xf32>
    %334 = vector.shape_cast %333 : vector<1x1x128xf32> to vector<1x128xf32>
    %335 = vector.shape_cast %332 : vector<1x128xf32> to vector<1x1x128xf32>
    tpu.vector_store %arg6[%c9_190, %c0_191, %c0_192], %335 {strides = array<i32>} : memref<10x1x128xf32, #tpu.memory_space<vmem>>, vector<1x1x128xf32>,
    return
  }
  func.func @transform_0(%arg0: i32) -> (i32, i32, i32) {
    %c0_i32 = arith.constant 0 : i32
    %c0_i32_0 = arith.constant 0 : i32
    %c0_i32_1 = arith.constant 0 : i32
    return %c0_i32, %arg0, %c0_i32_0 : i32, i32, i32
  }
  func.func @transform_1(%arg0: i32) -> (i32, i32) {
    %c0_i32 = arith.constant 0 : i32
    %c0_i32_0 = arith.constant 0 : i32
    %c0_i32_1 = arith.constant 0 : i32
    return %c0_i32, %c0_i32_0 : i32, i32
  }
  func.func @transform_2(%arg0: i32) -> (i32, i32) {
    %c0_i32 = arith.constant 0 : i32
    %c0_i32_0 = arith.constant 0 : i32
    %c0_i32_1 = arith.constant 0 : i32
    return %c0_i32, %c0_i32_0 : i32, i32
  }
  func.func @transform_3(%arg0: i32) -> (i32, i32) {
    %c0_i32 = arith.constant 0 : i32
    %c0_i32_0 = arith.constant 0 : i32
    %c0_i32_1 = arith.constant 0 : i32
    return %c0_i32, %c0_i32_0 : i32, i32
  }
  func.func @transform_4(%arg0: i32) -> (i32, i32) {
    %c0_i32 = arith.constant 0 : i32
    %c0_i32_0 = arith.constant 0 : i32
    %c0_i32_1 = arith.constant 0 : i32
    return %c0_i32, %c0_i32_0 : i32, i32
  }
  func.func @transform_5(%arg0: i32) -> (i32, i32, i32) {
    %c0_i32 = arith.constant 0 : i32
    %c0_i32_0 = arith.constant 0 : i32
    %c0_i32_1 = arith.constant 0 : i32
    return %c0_i32, %arg0, %c0_i32_0 : i32, i32, i32
  }
}

</mosaic_0001>

<bundles_post_ra>
// kernel: tpu_custom_call.1
= control target key start
LH: loop header
LB: loop body
LE: loop exit
PB: predicated region body
PF: predicated region fallthrough
CT: control target
= control target key end

     0   :  { %10 = vsyncpa [#allocation3], 0  ;;  %s993_s0 = inlined_call_operand.hbm [shape: f32[3,1,128], index: 0, kind: input, shape index: {}]   ;;  %s994_s1 = inlined_call_operand.hbm [shape: f32[3,5], index: 1, kind: input, shape index: {}]   ;;  %s995_s2 = inlined_call_operand.vmem [shape: f32[1,5], index: 2, kind: input, shape index: {}]   ;;  %s996_s3 = inlined_call_operand.vmem [shape: f32[5,10], index: 3, kind: input, shape index: {}]   ;;  %s997_s4 = inlined_call_operand.vmem [shape: f32[1,10], index: 4, kind: input, shape index: {}]   ;;  %s998_s5 = inlined_call_operand.hbm [shape: f32[10,1,128], index: 5, kind: output, shape index: {}]  }
   0x1   :  { %11 = vsyncpa [#allocation5], 0 }
   0x2   :  { %12 = vsyncpa [#allocation6], 0 }
   0x3   :  { %13 = vsyncpa [#allocation10], 0  ;;  %s51_s20 = sshll.u32 %s996_s3, 4  ;;  %s52_s20 = int_to_ptr.vmem [resolvable:$true] %s51_s20 }
   0x4   :  { %14 = vsyncpa [#allocation4], 0  ;;  %s504_s21 = scalar_lea.vmem %s52_s20, 128  ;;  %p509_p1 = scmp.lt.s32.totalorder %s52_s20, %s52_s20 }
   0x5   :  { %p505_p0 = scmp.ne.s32.totalorder %s52_s20, %s504_s21  ;;  %p510_p2 = scmp.lt.s32.totalorder %s504_s21, %s504_s21 }
   0x7   :  { %p511_p3 = por %p510_p2, %p509_p1 }
   0x9   :  { %p512_p4 = pnand %p511_p3, %p505_p0 }
   0xb   :  { %515 = shalt.err (!%p512_p4)
}
   0xc   :  { %s604_s22 = smov [#allocation9]   ;;  %s605_s23 = smov [#allocation2]  }
   0xd   :  { %54 = dma.vmem_to_smem %s52_s20, 128, %s604_s22, [#allocation10]  }
   0xe   :  { %s20_s24 = sshll.u32 %s605_s23, 4  ;;  %s516_s27 = scalar_lea.hbm %s993_s0, 48  ;;  %s21_s24 = int_to_ptr.vmem [resolvable:$true] %s20_s24 }
   0xf   :  { %p517_p5 = scmp.ne.s32.totalorder %s993_s0, %s516_s27  ;;  %p520_p6 = scmp.lt.u32.totalorder %s516_s27, %s993_s0 }
  0x11   :  { %p522_p7 = pnand %p520_p6, %p517_p5 }
  0x13   :  { %525 = shalt.err (!%p522_p7)
}
  0x14   :  { %s526_s6 = scalar_lea.vmem %s21_s24, 48  ;;  %s530_s7 = scalar_lea.vmem %s21_s24, 64 }
  0x15   :  { %p527_p8 = scmp.ne.s32.totalorder %s21_s24, %s526_s6  ;;  %p531_p9 = scmp.lt.s32.totalorder %s21_s24, %s21_s24 }
  0x16   :  { %p532_p10 = scmp.lt.s32.totalorder %s530_s7, %s526_s6 }
  0x18   :  { %p533_p11 = por %p532_p10, %p531_p9 }
  0x1a   :  { %p534_p12 = pnand %p533_p11, %p527_p8 }
  0x1c   :  { %537 = shalt.err (!%p534_p12)
}
  0x1d   :  { %s606_s8 = smov 16   ;;  %s607_s9 = smov 1  }
  0x1e   :  { %26 = dma.hbm_to_vmem [thread:$0]  %s993_s0, 48, %s21_s24, [#allocation3], %s606_s8, %s606_s8, %s607_s9  }
  0x1f   :  { %s41_s14 = sshll.u32 %s995_s2, 4  ;;  %s538_s17 = scalar_lea.hbm %s994_s1, 64  ;;  %s42_s14 = int_to_ptr.vmem [resolvable:$true] %s41_s14 }
  0x20   :  { %p539_p13 = scmp.ne.s32.totalorder %s994_s1, %s538_s17  ;;  %p542_p0 = scmp.lt.u32.totalorder %s538_s17, %s994_s1 }
  0x22   :  { %p544_p1 = pnand %p542_p0, %p539_p13 }
  0x24   :  { %547 = shalt.err (!%p544_p1)
}
  0x25   :  { %s608_s22 = smov [#allocation7]   ;;  %s548_s2 = scalar_lea.vmem %s42_s14, 16 }
  0x26   :  { %34 = dma.hbm_to_smem %s994_s1, 64, %s608_s22, [#allocation5]  }
  0x27   :  { %p549_p2 = scmp.ne.s32.totalorder %s42_s14, %s548_s2  ;;  %p553_p3 = scmp.lt.s32.totalorder %s42_s14, %s42_s14 }
  0x28   :  { %p554_p4 = scmp.lt.s32.totalorder %s548_s2, %s548_s2 }
  0x2a   :  { %p555_p5 = por %p554_p4, %p553_p3 }
  0x2c   :  { %p556_p6 = pnand %p555_p5, %p549_p2 }
  0x2e   :  { %559 = shalt.err (!%p556_p6)
}
  0x2f   :  { %s609_s24 = smov [#allocation8]   ;;  %s61_s27 = sshll.u32 %s997_s4, 4  ;;  %s62_s27 = int_to_ptr.vmem [resolvable:$true] %s61_s27 }
  0x30   :  { %44 = dma.vmem_to_smem %s42_s14, 16, %s609_s24, [#allocation6]  }
  0x31   :  { %s560_s28 = scalar_lea.vmem %s62_s27, 16  ;;  %p565_p8 = scmp.lt.s32.totalorder %s62_s27, %s62_s27 }
  0x32   :  { %p561_p7 = scmp.ne.s32.totalorder %s62_s27, %s560_s28  ;;  %p566_p9 = scmp.lt.s32.totalorder %s560_s28, %s560_s28 }
  0x34   :  { %p567_p10 = por %p566_p9, %p565_p8 }
  0x36   :  { %p568_p11 = pnand %p567_p10, %p561_p7 }
  0x38   :  { %571 = shalt.err (!%p568_p11)
}
  0x39   :  { %s610_s1 = smov [#allocation11]  }
  0x3a   :  { %64 = dma.vmem_to_smem %s62_s27, 16, %s610_s1, [#allocation10]  }
  0x3b   :  { %594 = dma.done.wait [#allocation3], 48  }
  0x3c   :  { %595 = vsyncadd [#allocation3], 4294967248 }
  0x3d   :  { %596 = dma.done.wait [#allocation5], 64  }
  0x3e   :  { %597 = vsyncadd [#allocation5], 4294967232 }
  0x3f   :  { %598 = dma.done.wait [#allocation6], 16  }
  0x40   :  { %599 = vsyncadd [#allocation6], 4294967280 }
  0x41   :  { %600 = dma.done.wait [#allocation10], 144  }
  0x42   :  { %601 = vsyncadd [#allocation10], 4294967152 }
  0x43   :  { %80 = sfence }
  0x44   :  { %s86_s4 = sld [smem:[#allocation7]]  ;;  %s422_s6 = sld [smem:[#allocation7 + $0x1]]  ;;  %v680_v0 = vld [vmem:[#allocation2] sm:$0x1]  ;;  %v684_v1 = vld [vmem:[#allocation2 + $0x1] sm:$0x1] }
  0x45   :  { %s420_s3 = sld [smem:[#allocation7 + $0x80]]  ;;  %s423_s7 = sld [smem:[#allocation7 + $0x81]]  ;;  %v690_v2 = vld [vmem:[#allocation2 + $0x2] sm:$0x1] }
  0x46   :  { %s421_s29 = sld [smem:[#allocation7 + $0x100]]  ;;  %s424_s10 = sld [smem:[#allocation7 + $0x101]] }
  0x47   :  { %s678_s30 = sld [smem:[#allocation8]]  ;;  %s682_s11 = sld [smem:[#allocation8 + $0x1]] }
  0x48   :  { %s686_s12 = sld [smem:[#allocation7 + $0x2]]  ;;  %s696_s16 = sld [smem:[#allocation7 + $0x3]] }
  0x49   :  { %s688_s13 = sld [smem:[#allocation7 + $0x82]]  ;;  %s698_s17 = sld [smem:[#allocation7 + $0x83]] }
  0x4a   :  { %s692_s14 = sld [smem:[#allocation7 + $0x102]]  ;;  %v87_v3 = vstv %s86_s4  ;;  %s702_s18 = sld [smem:[#allocation7 + $0x103]]  ;;  %v102_v10 = vstv %s422_s6 }
  0x4b   :  { %s694_s15 = sld [smem:[#allocation8 + $0x2]]  ;;  %v90_v4 = vstv %s420_s3  ;;  %v88_v5 = vmul.f32 %v87_v3, %v680_v0  ;;  %s704_s19 = sld [smem:[#allocation8 + $0x3]]  ;;  %v105_v11 = vstv %s423_s7  ;;  %v103_v13 = vmul.f32 %v102_v10, %v680_v0 }
  0x4c   :  { %v91_v6 = vmul.f32 %v90_v4, %v684_v1  ;;  %v94_v7 = vstv %s421_s29  ;;  %s708_s20 = sld [smem:[#allocation7 + $0x4]]  ;;  %v106_v14 = vmul.f32 %v105_v11, %v684_v1  ;;  %v109_v15 = vstv %s424_s10  ;;  %s720_s0 = sld [smem:[#allocation9]] }
  0x4d   :  { %v95_v8 = vmul.f32 %v94_v7, %v690_v2  ;;  %v98_v9 = vstv %s678_s30  ;;  %s710_s21 = sld [smem:[#allocation7 + $0x84]]  ;;  %v110_v16 = vmul.f32 %v109_v15, %v690_v2  ;;  %v113_v17 = vstv %s682_s11  ;;  %s724_s23 = sld [smem:[#allocation9 + $0x80]] }
  0x4e   :  { %v92_v12 = vadd.f32 %v91_v6, %v88_v5  ;;  %s714_s22 = sld [smem:[#allocation7 + $0x104]]  ;;  %v117_v18 = vstv %s686_s12  ;;  %v107_v21 = vadd.f32 %v106_v14, %v103_v13  ;;  %v132_v26 = vstv %s696_s16  ;;  %s732_s24 = sld [smem:[#allocation9 + $0x100]] }
  0x4f   :  { %v120_v19 = vstv %s688_s13  ;;  %v118_v22 = vmul.f32 %v117_v18, %v680_v0  ;;  %v135_v27 = vstv %s698_s17  ;;  %s730_s2 = sld [smem:[#allocation8 + $0x4]]  ;;  %s735_s25 = sld [smem:[#allocation9 + $0x180]]  ;;  %v133_v32 = vmul.f32 %v132_v26, %v680_v0 }
  0x50   :  { %v96_v20 = vadd.f32 %v95_v8, %v92_v12  ;;  %v121_v23 = vmul.f32 %v120_v19, %v684_v1  ;;  %v124_v24 = vstv %s692_s14  ;;  %v111_v29 = vadd.f32 %v110_v16, %v107_v21  ;;  %s737_s26 = sld [smem:[#allocation9 + $0x200]]  ;;  %s743_s27 = sld [smem:[#allocation9 + $0x1]] }
  0x51   :  { %v128_v25 = vstv %s694_s15  ;;  %v125_v31 = vmul.f32 %v124_v24, %v690_v2  ;;  %v136_v33 = vmul.f32 %v135_v27, %v684_v1  ;;  %v139_v34 = vstv %s702_s18  ;;  %s745_s28 = sld [smem:[#allocation9 + $0x81]]  ;;  %s761_s3 = sld [smem:[#allocation11]] }
  0x52   :  { %v99_v28 = vadd.f32 %v98_v9, %v96_v20  ;;  %v122_v30 = vadd.f32 %v121_v23, %v118_v22  ;;  %v143_v35 = vstv %s704_s19  ;;  %v114_v37 = vadd.f32 %v113_v17, %v111_v29  ;;  %s750_s1 = sld [smem:[#allocation9 + $0x101]]  ;;  %s767_s30 = sld [smem:[#allocation9 + $0x2]] }
  0x53   :  { %v140_v39 = vmul.f32 %v139_v34, %v690_v2  ;;  %v137_v40 = vadd.f32 %v136_v33, %v133_v32  ;;  %v147_v41 = vstv %s708_s20  ;;  %v150_v42 = vstv %s710_s21  ;;  %s755_s4 = sld [smem:[#allocation9 + $0x181]]  ;;  %s769_s6 = sld [smem:[#allocation9 + $0x82]] }
  0x54   :  { %v747_v36 = vmax.f32 %v99_v28, 0.0  ;;  %v126_v38 = vadd.f32 %v125_v31, %v122_v30  ;;  %v154_v43 = vstv %s714_s22  ;;  %v757_v44 = vmax.f32 %v114_v37, 0.0  ;;  %s763_s29 = sld [smem:[#allocation9 + $0x201]]  ;;  %s775_s7 = sld [smem:[#allocation9 + $0x102]] }
  0x55   :  { %v148_v46 = vmul.f32 %v147_v41, %v680_v0  ;;  %v151_v47 = vmul.f32 %v150_v42, %v684_v1  ;;  %v141_v48 = vadd.f32 %v140_v39, %v137_v40  ;;  %v155_v49 = vmul.f32 %v154_v43, %v690_v2  ;;  %s780_s10 = sld [smem:[#allocation9 + $0x182]]  ;;  %s787_s12 = sld [smem:[#allocation11 + $0x1]] }
  0x56   :  { %v129_v45 = vadd.f32 %v128_v25, %v126_v38  ;;  %v162_v50 = vstv %s720_s0  ;;  %v165_v54 = vstv %s724_s23  ;;  %v158_v56 = vstv %s730_s2  ;;  %s782_s11 = sld [smem:[#allocation9 + $0x202]]  ;;  %s793_s13 = sld [smem:[#allocation9 + $0x3]] }
  0x57   :  { %v152_v52 = vadd.f32 %v151_v47, %v148_v46  ;;  %v163_v53 = vmul.f32 %v162_v50, %v747_v36  ;;  %v144_v55 = vadd.f32 %v143_v35, %v141_v48  ;;  %v166_v57 = vmul.f32 %v165_v54, %v757_v44  ;;  %s798_s14 = sld [smem:[#allocation9 + $0x83]]  ;;  %s811_s17 = sld [smem:[#allocation11 + $0x2]] }
  0x58   :  { %v771_v51 = vmax.f32 %v129_v45, 0.0  ;;  %v169_v58 = vstv %s732_s24  ;;  %v173_v61 = vstv %s735_s25  ;;  %v177_v62 = vstv %s737_s26  ;;  %s803_s15 = sld [smem:[#allocation9 + $0x103]]  ;;  %s818_s19 = sld [smem:[#allocation9 + $0x4]] }
  0x59   :  { %v156_v59 = vadd.f32 %v155_v49, %v152_v52  ;;  %v789_v63 = vmax.f32 %v144_v55, 0.0  ;;  %v167_v0 = vadd.f32 %v166_v57, %v163_v53  ;;  %v185_v1 = vstv %s743_s27  ;;  %s805_s16 = sld [smem:[#allocation9 + $0x183]]  ;;  %s820_s20 = sld [smem:[#allocation9 + $0x84]] }
  0x5a   :  { %v170_v60 = vmul.f32 %v169_v58, %v771_v51  ;;  %v188_v2 = vstv %s745_s28  ;;  %v186_v4 = vmul.f32 %v185_v1, %v747_v36  ;;  %v192_v6 = vstv %s750_s1  ;;  %s813_s18 = sld [smem:[#allocation9 + $0x203]]  ;;  %s825_s21 = sld [smem:[#allocation9 + $0x104]] }
  0x5b   :  { %v159_v3 = vadd.f32 %v158_v56, %v156_v59  ;;  %v189_v5 = vmul.f32 %v188_v2, %v757_v44  ;;  %v174_v8 = vmul.f32 %v173_v61, %v789_v63  ;;  %v193_v9 = vmul.f32 %v192_v6, %v771_v51  ;;  %s827_s22 = sld [smem:[#allocation9 + $0x184]]  ;;  %s835_s0 = sld [smem:[#allocation11 + $0x3]] }
  0x5c   :  { %v171_v7 = vadd.f32 %v170_v60, %v167_v0  ;;  %v196_v10 = vstv %s755_s4  ;;  %v200_v14 = vstv %s763_s29  ;;  %v181_v16 = vstv %s761_s3  ;;  %s837_s23 = sld [smem:[#allocation9 + $0x204]]  ;;  %s842_s2 = sld [smem:[#allocation9 + $0x5]] }
  0x5d   :  { %v807_v11 = vmax.f32 %v159_v3, 0.0  ;;  %v190_v12 = vadd.f32 %v189_v5, %v186_v4  ;;  %v197_v13 = vmul.f32 %v196_v10, %v789_v63  ;;  %v209_v17 = vstv %s767_s30  ;;  %s844_s24 = sld [smem:[#allocation9 + $0x85]]  ;;  %s858_s27 = sld [smem:[#allocation11 + $0x4]] }
  0x5e   :  { %v175_v15 = vadd.f32 %v174_v8, %v171_v7  ;;  %v212_v18 = vstv %s769_s6  ;;  %v210_v22 = vmul.f32 %v209_v17, %v747_v36  ;;  %v216_v24 = vstv %s775_s7  ;;  %s848_s25 = sld [smem:[#allocation9 + $0x105]]  ;;  %s864_s1 = sld [smem:[#allocation9 + $0x6]] }
  0x5f   :  { %v178_v19 = vmul.f32 %v177_v62, %v807_v11  ;;  %v194_v20 = vadd.f32 %v193_v9, %v190_v12  ;;  %v201_v21 = vmul.f32 %v200_v14, %v807_v11  ;;  %v213_v23 = vmul.f32 %v212_v18, %v757_v44  ;;  %s850_s26 = sld [smem:[#allocation9 + $0x185]]  ;;  %s866_s4 = sld [smem:[#allocation9 + $0x86]] }
  0x60   :  { %v220_v25 = vstv %s780_s10  ;;  %v224_v26 = vstv %s782_s11  ;;  %v204_v29 = vstv %s787_s12  ;;  %v217_v30 = vmul.f32 %v216_v24, %v771_v51  ;;  %s860_s28 = sld [smem:[#allocation9 + $0x205]]  ;;  %s872_s3 = sld [smem:[#allocation9 + $0x106]] }
  0x61   :  { %v179_v27 = vadd.f32 %v178_v19, %v175_v15  ;;  %v198_v28 = vadd.f32 %v197_v13, %v194_v20  ;;  %v214_v31 = vadd.f32 %v213_v23, %v210_v22  ;;  %v221_v32 = vmul.f32 %v220_v25, %v789_v63  ;;  %s874_s29 = sld [smem:[#allocation9 + $0x186]]  ;;  %s882_s30 = sld [smem:[#allocation11 + $0x5]] }
  0x62   :  { %v225_v33 = vmul.f32 %v224_v26, %v807_v11  ;;  %v233_v34 = vstv %s793_s13  ;;  %v236_v39 = vstv %s798_s14  ;;  %v240_v42 = vstv %s803_s15  ;;  %s884_s6 = sld [smem:[#allocation9 + $0x206]]  ;;  %s887_s7 = sld [smem:[#allocation9 + $0x7]] }
  0x63   :  { %v182_v35 = vadd.f32 %v181_v16, %v179_v27  ;;  %v202_v37 = vadd.f32 %v201_v21, %v198_v28  ;;  %v234_v38 = vmul.f32 %v233_v34, %v747_v36  ;;  %v218_v40 = vadd.f32 %v217_v30, %v214_v31  ;;  %s889_s10 = sld [smem:[#allocation9 + $0x87]]  ;;  %s905_s13 = sld [smem:[#allocation11 + $0x6]] }
  0x64   :  { %v237_v41 = vmul.f32 %v236_v39, %v757_v44  ;;  %v244_v43 = vstv %s805_s16  ;;  %v228_v46 = vstv %s811_s17  ;;  %v241_v47 = vmul.f32 %v240_v42, %v771_v51  ;;  %s895_s11 = sld [smem:[#allocation9 + $0x107]]  ;;  %s910_s15 = sld [smem:[#allocation9 + $0x8]] }
  0x65   :  { %183 = vst [vmem:[#allocation12] sm:$0x1] %v182_v35  ;;  %v205_v45 = vadd.f32 %v204_v29, %v202_v37  ;;  %v248_v48 = vstv %s813_s18  ;;  %v222_v49 = vadd.f32 %v221_v32, %v218_v40  ;;  %v245_v52 = vmul.f32 %v244_v43, %v789_v63  ;;  %s897_s12 = sld [smem:[#allocation9 + $0x187]]  ;;  %s912_s16 = sld [smem:[#allocation9 + $0x88]] }
  0x66   :  { %v238_v50 = vadd.f32 %v237_v41, %v234_v38  ;;  %v249_v53 = vmul.f32 %v248_v48, %v807_v11  ;;  %v257_v54 = vstv %s818_s19  ;;  %v260_v55 = vstv %s820_s20  ;;  %s907_s14 = sld [smem:[#allocation9 + $0x207]]  ;;  %s918_s17 = sld [smem:[#allocation9 + $0x108]] }
  0x67   :  { %207 = vst [vmem:[#allocation12 + $0x1] sm:$0x1] %v205_v45  ;;  %v264_v56 = vstv %s825_s21  ;;  %v268_v57 = vstv %s827_s22  ;;  %v226_v58 = vadd.f32 %v225_v33, %v222_v49  ;;  %v258_v60 = vmul.f32 %v257_v54, %v747_v36  ;;  %s920_s18 = sld [smem:[#allocation9 + $0x188]]  ;;  %s928_s19 = sld [smem:[#allocation11 + $0x7]] }
  0x68   :  { %v242_v59 = vadd.f32 %v241_v47, %v238_v50  ;;  %v261_v61 = vmul.f32 %v260_v55, %v757_v44  ;;  %v252_v62 = vstv %s835_s0  ;;  %v265_v0 = vmul.f32 %v264_v56, %v771_v51  ;;  %s930_s20 = sld [smem:[#allocation9 + $0x208]]  ;;  %s933_s21 = sld [smem:[#allocation9 + $0x9]] }
  0x69   :  { %v269_v1 = vmul.f32 %v268_v57, %v789_v63  ;;  %v272_v2 = vstv %s837_s23  ;;  %v229_v3 = vadd.f32 %v228_v46, %v226_v58  ;;  %v281_v7 = vstv %s842_s2  ;;  %s935_s22 = sld [smem:[#allocation9 + $0x89]] }
  0x6a   :  { %v246_v4 = vadd.f32 %v245_v52, %v242_v59  ;;  %v262_v5 = vadd.f32 %v261_v61, %v258_v60  ;;  %v273_v6 = vmul.f32 %v272_v2, %v807_v11  ;;  %v284_v8 = vstv %s844_s24  ;;  %s941_s0 = sld [smem:[#allocation9 + $0x109]]  ;;  %s958_s24 = sld [smem:[#allocation11 + $0x8]] }
  0x6b   :  { %v288_v9 = vstv %s848_s25  ;;  %v292_v10 = vstv %s850_s26  ;;  %231 = vst [vmem:[#allocation12 + $0x2] sm:$0x1] %v229_v3  ;;  %v282_v14 = vmul.f32 %v281_v7, %v747_v36  ;;  %v285_v15 = vmul.f32 %v284_v8, %v757_v44  ;;  %s943_s23 = sld [smem:[#allocation9 + $0x189]]  ;;  %s611_s26 = smov [#allocation12]  }
  0x6c   :  { %v250_v12 = vadd.f32 %v249_v53, %v246_v4  ;;  %v266_v13 = vadd.f32 %v265_v0, %v262_v5  ;;  %v276_v16 = vstv %s858_s27  ;;  %v289_v17 = vmul.f32 %v288_v9, %v771_v51  ;;  %s951_s2 = sld [smem:[#allocation9 + $0x209]]  ;;  %s405_s27 = sshll.u32 %s611_s26, 4  ;;  %s406_s27 = int_to_ptr.vmem [resolvable:$true] %s405_s27 }
  0x6d   :  { %v293_v18 = vmul.f32 %v292_v10, %v789_v63  ;;  %v296_v19 = vstv %s860_s28  ;;  %v286_v22 = vadd.f32 %v285_v15, %v282_v14  ;;  %v305_v24 = vstv %s864_s1  ;;  %s495_s25 = sld [smem:[#allocation11 + $0x9]]  ;;  %s572_s28 = scalar_lea.vmem %s406_s27, 160 }
  0x6e   :  { %v253_v20 = vadd.f32 %v252_v62, %v250_v12  ;;  %v270_v21 = vadd.f32 %v269_v1, %v266_v13  ;;  %v297_v23 = vmul.f32 %v296_v19, %v807_v11  ;;  %v308_v25 = vstv %s866_s4  ;;  %p573_p12 = scmp.ne.s32.totalorder %s406_s27, %s572_s28  ;;  %p577_p13 = scmp.lt.s32.totalorder %s406_s27, %s406_s27 }
  0x6f   :  { %v312_v26 = vstv %s872_s3  ;;  %v316_v27 = vstv %s874_s29  ;;  %v290_v29 = vadd.f32 %v289_v17, %v286_v22  ;;  %v306_v30 = vmul.f32 %v305_v24, %v747_v36  ;;  %p578_p0 = scmp.lt.s32.totalorder %s572_s28, %s572_s28 }
  0x70   :  { %255 = vst [vmem:[#allocation12 + $0x3] sm:$0x1] %v253_v20  ;;  %v274_v28 = vadd.f32 %v273_v6, %v270_v21  ;;  %v309_v31 = vmul.f32 %v308_v25, %v757_v44  ;;  %v300_v32 = vstv %s882_s30  ;;  %v313_v33 = vmul.f32 %v312_v26, %v771_v51 }
  0x71   :  { %v317_v34 = vmul.f32 %v316_v27, %v789_v63  ;;  %v320_v35 = vstv %s884_s6  ;;  %v294_v38 = vadd.f32 %v293_v18, %v290_v29  ;;  %v329_v41 = vstv %s887_s7  ;;  %p579_p1 = por %p578_p0, %p577_p13 }
  0x72   :  { %v277_v37 = vadd.f32 %v276_v16, %v274_v28  ;;  %v310_v39 = vadd.f32 %v309_v31, %v306_v30  ;;  %v321_v40 = vmul.f32 %v320_v35, %v807_v11  ;;  %v332_v42 = vstv %s889_s10 }
  0x73   :  { %v336_v43 = vstv %s895_s11  ;;  %v340_v45 = vstv %s897_s12  ;;  %v298_v46 = vadd.f32 %v297_v23, %v294_v38  ;;  %v330_v48 = vmul.f32 %v329_v41, %v747_v36  ;;  %p580_p2 = pnand %p579_p1, %p573_p12 }
  0x74   :  { %279 = vst [vmem:[#allocation12 + $0x4] sm:$0x1] %v277_v37  ;;  %v314_v47 = vadd.f32 %v313_v33, %v310_v39  ;;  %v333_v49 = vmul.f32 %v332_v42, %v757_v44  ;;  %v324_v50 = vstv %s905_s13  ;;  %v337_v52 = vmul.f32 %v336_v43, %v771_v51 }
  0x75   :  { %v341_v53 = vmul.f32 %v340_v45, %v789_v63  ;;  %v344_v54 = vstv %s907_s14  ;;  %v301_v55 = vadd.f32 %v300_v32, %v298_v46  ;;  %v353_v59 = vstv %s910_s15 }
  0x76   :  { %v318_v56 = vadd.f32 %v317_v34, %v314_v47  ;;  %v334_v57 = vadd.f32 %v333_v49, %v330_v48  ;;  %v345_v58 = vmul.f32 %v344_v54, %v807_v11  ;;  %v356_v60 = vstv %s912_s16 }
  0x77   :  { %v360_v61 = vstv %s918_s17  ;;  %v364_v62 = vstv %s920_s18  ;;  %303 = vst [vmem:[#allocation12 + $0x5] sm:$0x1] %v301_v55  ;;  %v354_v2 = vmul.f32 %v353_v59, %v747_v36  ;;  %v357_v3 = vmul.f32 %v356_v60, %v757_v44 }
  0x78   :  { %v322_v0 = vadd.f32 %v321_v40, %v318_v56  ;;  %v338_v1 = vadd.f32 %v337_v52, %v334_v57  ;;  %v348_v4 = vstv %s928_s19  ;;  %v361_v5 = vmul.f32 %v360_v61, %v771_v51 }
  0x79   :  { %v365_v6 = vmul.f32 %v364_v62, %v789_v63  ;;  %v368_v7 = vstv %s930_s20  ;;  %v358_v10 = vadd.f32 %v357_v3, %v354_v2  ;;  %v377_v13 = vstv %s933_s21 }
  0x7a   :  { %v325_v8 = vadd.f32 %v324_v50, %v322_v0  ;;  %v342_v9 = vadd.f32 %v341_v53, %v338_v1  ;;  %v369_v12 = vmul.f32 %v368_v7, %v807_v11  ;;  %v380_v14 = vstv %s935_s22 }
  0x7b   :  { %v384_v15 = vstv %s941_s0  ;;  %v388_v16 = vstv %s943_s23  ;;  %v362_v18 = vadd.f32 %v361_v5, %v358_v10  ;;  %v378_v19 = vmul.f32 %v377_v13, %v747_v36 }
  0x7c   :  { %327 = vst [vmem:[#allocation12 + $0x6] sm:$0x1] %v325_v8  ;;  %v346_v17 = vadd.f32 %v345_v58, %v342_v9  ;;  %v381_v20 = vmul.f32 %v380_v14, %v757_v44  ;;  %v385_v21 = vmul.f32 %v384_v15, %v771_v51  ;;  %v392_v22 = vstv %s951_s2 }
  0x7d   :  { %v366_v24 = vadd.f32 %v365_v6, %v362_v18  ;;  %v389_v26 = vmul.f32 %v388_v16, %v789_v63  ;;  %v372_v27 = vstv %s958_s24  ;;  %v393_v30 = vmul.f32 %v392_v22, %v807_v11 }
  0x7e   :  { %v349_v23 = vadd.f32 %v348_v4, %v346_v17  ;;  %v382_v25 = vadd.f32 %v381_v20, %v378_v19  ;;  %v396_v33 = vstv %s495_s25 }
  0x7f   :  { %v370_v28 = vadd.f32 %v369_v12, %v366_v24 }
  0x80   :  { %351 = vst [vmem:[#allocation12 + $0x7] sm:$0x1] %v349_v23  ;;  %v386_v29 = vadd.f32 %v385_v21, %v382_v25 }
  0x81   :  { %v373_v31 = vadd.f32 %v372_v27, %v370_v28 }
  0x82   :  { %v390_v32 = vadd.f32 %v389_v26, %v386_v29 }
  0x83   :  { %375 = vst [vmem:[#allocation12 + $0x8] sm:$0x1] %v373_v31 }
  0x84   :  { %v394_v36 = vadd.f32 %v393_v30, %v390_v32 }
  0x86   :  { %v397_v44 = vadd.f32 %v396_v33, %v394_v36 }
  0x88   :  { %399 = vst [vmem:[#allocation12 + $0x9] sm:$0x1] %v397_v44 }
  0x89   :  { %583 = shalt.err (!%p580_p2)
}
  0x8a   :  { %s584_s3 = scalar_lea.hbm %s998_s5, 160 }
  0x8b   :  { %p585_p3 = scmp.ne.s32.totalorder %s998_s5, %s584_s3  ;;  %p588_p4 = scmp.lt.u32.totalorder %s584_s3, %s998_s5 }
  0x8d   :  { %p590_p5 = pnand %p588_p4, %p585_p3 }
  0x8f   :  { %593 = shalt.err (!%p590_p5)
}
  0x90   :  { %411 = dma.vmem_to_hbm [thread:$0]  %s406_s27, 160, %s998_s5, [#allocation4], %s606_s8, %s606_s8, %s607_s9  }
  0x91   :  { %602 = dma.done.wait [#allocation4], 160  }
  0x92   :  { %603 = vsyncadd [#allocation4], 4294967136 }
  0x93   :  { %415 = vsyncpa [#allocation3], 1 }
  0x94   :  { %416 = vsyncpa [#allocation4], 1 }
  0x95   :  { %417 = vsyncpa [#allocation5], 1 }
  0x96   :  { %418 = vsyncpa [#allocation6], 1 }
  0x97   :  { %419 = vsyncpa [#allocation10], 1 }

</bundles_post_ra>
